<compile_context>
chip_gen: v7x
topology: tpu7x:2x2x1
jax: 0.10.0
libtpu: 0.0.40
codegen_flags: <defaults>
</compile_context>

<pallas_src>
import functools

import jax
import jax.numpy as jnp
from jax.experimental import pallas as pl
from jax.experimental.pallas import tpu as pltpu

LANES = 128
SUBLANES = 8


def _nmse_kernel(p_ref, t_ref, o_ref, acc_ref, *, full_rows, rem_lanes,
                 tiles_per_core, tile_rows):
    c = pl.program_id(0)   # core-split axis ("parallel")
    i = pl.program_id(1)   # reduction axis ("arbitrary")

    @pl.when(i == 0)
    def _init():
        acc_ref[...] = jnp.zeros_like(acc_ref)

    # Logical tile this (core, step) owns. Tiles past the real end (possible
    # when num_tiles % ncores != 0) are fully masked out below.
    tile_id = c * tiles_per_core + i

    # Mask by the true (unpadded) element count: element is valid iff its
    # global row < full_rows, or it sits in the partial row's first rem lanes.
    row = jax.lax.broadcasted_iota(jnp.int32, (tile_rows, LANES), 0)
    lane = jax.lax.broadcasted_iota(jnp.int32, (tile_rows, LANES), 1)
    grow = tile_id * tile_rows + row
    mask = (grow < full_rows) | ((grow == full_rows) & (lane < rem_lanes))

    p = p_ref[...].astype(jnp.float32)
    t = t_ref[...].astype(jnp.float32)
    d = (p + 1e-6) - (t + 1e-6)          # match the PyTorch forward exactly
    d = jnp.where(mask, d, 0.0)
    dd = d * d
    # Keep accumulation vreg-shaped: sum row-groups down to one (8,128) slab
    # with plain VPU adds (no XLU reduce, no narrow scalar dependency).
    acc_ref[...] += dd.reshape(tile_rows // SUBLANES, SUBLANES, LANES).sum(axis=0)

    @pl.when(i == tiles_per_core - 1)
    def _finalize():
        o_ref[...] = acc_ref[...].reshape(1, SUBLANES, LANES)


def nmse(predictions, true, H_T_1=None, *, max_tile_rows=1024, num_cores=2):
    """sqrt(mean((pred + 1e-6 - (true + 1e-6))**2)) over all elements."""
    del H_T_1  # unused by the reference module
    assert predictions.shape == true.shape

    n = predictions.size  # static Python int
    p = predictions.reshape(-1)
    t = true.reshape(-1)

    # View as a lane-dense (rows, 128) slab. Pad (zeros) only when needed, and
    # only up to the next multiple of 8*128 = 1024 elements (<= 1023 extra).
    chunk = SUBLANES * LANES
    rows = pl.cdiv(n, chunk) * SUBLANES
    pad = rows * LANES - n
    if pad:
        p = jnp.pad(p, (0, pad))
        t = jnp.pad(t, (0, pad))
    p2d = p.reshape(rows, LANES)
    t2d = t.reshape(rows, LANES)

    # Large tiles: up to max_tile_rows rows (multiple of 8), never larger than
    # the slab itself.  (1024,128) f32 = 512 KiB; x2 inputs x2 pipeline buffers
    # = 2 MiB, comfortably inside every generation's scoped VMEM.
    tile_rows = min(max_tile_rows, rows)
    num_tiles = pl.cdiv(rows, tile_rows)

    # Split the reduction across TensorCores (2x on v7x; no-op on 1-TC chips).
    ncores = num_cores if num_tiles >= num_cores else 1
    tiles_per_core = pl.cdiv(num_tiles, ncores)

    def in_map(c, i):
        # Clamp so a core's trailing (fully out-of-range) tiles just re-read
        # the last real tile; their contribution is masked to zero in-kernel.
        return (jnp.minimum(c * tiles_per_core + i, num_tiles - 1), 0)

    kernel = functools.partial(
        _nmse_kernel,
        full_rows=n // LANES,
        rem_lanes=n % LANES,
        tiles_per_core=tiles_per_core,
        tile_rows=tile_rows,
    )

    partials = pl.pallas_call(
        kernel,
        out_shape=jax.ShapeDtypeStruct((ncores, SUBLANES, LANES), jnp.float32),
        grid_spec=pltpu.PrefetchScalarGridSpec(
            num_scalar_prefetch=0,
            grid=(ncores, tiles_per_core),
            in_specs=[
                pl.BlockSpec((tile_rows, LANES), in_map),
                pl.BlockSpec((tile_rows, LANES), in_map),
            ],
            out_specs=pl.BlockSpec((1, SUBLANES, LANES), lambda c, i: (c, 0, 0)),
            scratch_shapes=[pltpu.VMEM((SUBLANES, LANES), jnp.float32)],
        ),
        compiler_params=pltpu.CompilerParams(
            dimension_semantics=("parallel", "arbitrary"),
            vmem_limit_bytes=32 * 1024 * 1024,
        ),
    )(p2d, t2d)

    # Single final cross-lane reduce + sqrt (once, outside the hot loop).
    return jnp.sqrt(jnp.sum(partials) / n)


if __name__ == "__main__":
    key = jax.random.PRNGKey(0)
    kp, kt, kh = jax.random.split(key, 3)

    # Small NCHW-style shapes consistent with a deconvolution loss.
    predictions = jax.random.normal(kp, (2, 4, 16, 16), dtype=jnp.float32)
    true = jax.random.normal(kt, (2, 4, 16, 16), dtype=jnp.float32)
    H_T_1 = jax.random.normal(kh, (2, 4, 16, 16), dtype=jnp.float32)  # unused

    loss = nmse(predictions, true, H_T_1)
    jax.block_until_ready(loss)

    ref = jnp.sqrt(jnp.mean(((predictions + 1e-6) - (true + 1e-6)) ** 2))
    assert jnp.allclose(loss, ref, rtol=1e-5, atol=1e-6), (loss, ref)

    # Extra checks: ragged size (in-kernel tail masking) and a multi-tile /
    # two-core-split size.
    for idx, shape in enumerate([(3, 5, 7, 11), (2, 8, 128, 128)]):
        k1, k2 = jax.random.split(jax.random.fold_in(key, idx), 2)
        a = jax.random.normal(k1, shape, dtype=jnp.float32)
        b = jax.random.normal(k2, shape, dtype=jnp.float32)
        got = nmse(a, b, None)
        jax.block_until_ready(got)
        want = jnp.sqrt(jnp.mean(((a + 1e-6) - (b + 1e-6)) ** 2))
        assert jnp.allclose(got, want, rtol=1e-5, atol=1e-6), (shape, got, want)

    print("KERNEL_OK")
</pallas_src>

<mosaic_0001>
module attributes {stable_mosaic.version = 11 : i64} {
  func.func @_nmse_kernel(%arg0: i32, %arg1: i32, %arg2: memref<16x128xf32, #tpu.memory_space<vmem>>, %arg3: memref<16x128xf32, #tpu.memory_space<vmem>>, %arg4: memref<1x8x128xf32, #tpu.memory_space<vmem>>, %arg5: memref<8x128xf32, #tpu.memory_space<vmem>>) attributes {dimension_semantics = [#tpu.dimension_semantics<parallel>, #tpu.dimension_semantics<arbitrary>], iteration_bounds = array<i64: 1, 1>, scalar_prefetch = 0 : i64, scratch_operands = 1 : i64, tpu.core_type = #tpu.core_type<tc>, window_params = [{transform_indices = @transform_0, window_bounds = array<i64: 16, 128>}, {transform_indices = @transform_1, window_bounds = array<i64: 16, 128>}, {transform_indices = @transform_2, window_bounds = array<i64: 1, 8, 128>}]} {
    %c0_i32 = arith.constant 0 : i32
    %0 = arith.cmpi eq, %arg1, %c0_i32 : i32
    %1 = arith.extui %0 : i1 to i32
    %c0_i32_0 = arith.constant 0 : i32
    %2 = arith.cmpi ne, %1, %c0_i32_0 : i32
    scf.if %2 {
      %cst_16 = arith.constant 0.000000e+00 : f32
      %36 = vector.broadcast %cst_16 : f32 to vector<8x128xf32>
      %c0_17 = arith.constant 0 : index
      %c0_18 = arith.constant 0 : index
      %37 = vector.load %arg5[%c0_17, %c0_18] : memref<8x128xf32, #tpu.memory_space<vmem>>, vector<8x128xf32>
      tpu.vector_store %arg5[%c0_17, %c0_18], %36 {strides = array<i32>} : memref<8x128xf32, #tpu.memory_space<vmem>>, vector<8x128xf32>,
    } else {
    }
    %c1_i32 = arith.constant 1 : i32
    %3 = arith.muli %arg0, %c1_i32 : i32
    %4 = arith.addi %3, %arg1 : i32
    %5 = tpu.iota {dimensions = array<i32: 0>} : vector<16x128xi32>
    %6 = tpu.iota {dimensions = array<i32: 1>} : vector<16x128xi32>
    %c16_i32 = arith.constant 16 : i32
    %7 = arith.muli %4, %c16_i32 : i32
    %8 = vector.broadcast %7 : i32 to vector<16x128xi32>
    %9 = arith.addi %8, %5 : vector<16x128xi32>
    %c16_i32_1 = arith.constant 16 : i32
    %10 = vector.broadcast %c16_i32_1 : i32 to vector<16x128xi32>
    %11 = arith.cmpi slt, %9, %10 : vector<16x128xi32>
    %c16_i32_2 = arith.constant 16 : i32
    %12 = vector.broadcast %c16_i32_2 : i32 to vector<16x128xi32>
    %13 = arith.cmpi eq, %9, %12 : vector<16x128xi32>
    %c0_i32_3 = arith.constant 0 : i32
    %14 = vector.broadcast %c0_i32_3 : i32 to vector<16x128xi32>
    %15 = arith.cmpi slt, %6, %14 : vector<16x128xi32>
    %16 = arith.andi %13, %15 : vector<16x128xi1>
    %17 = arith.ori %11, %16 : vector<16x128xi1>
    %c0 = arith.constant 0 : index
    %c0_4 = arith.constant 0 : index
    %18 = vector.load %arg2[%c0, %c0_4] : memref<16x128xf32, #tpu.memory_space<vmem>>, vector<16x128xf32>
    %c0_5 = arith.constant 0 : index
    %c0_6 = arith.constant 0 : index
    %19 = vector.load %arg3[%c0_5, %c0_6] : memref<16x128xf32, #tpu.memory_space<vmem>>, vector<16x128xf32>
    %cst = arith.constant 9.99999997E-7 : f32
    %20 = vector.broadcast %cst : f32 to vector<16x128xf32>
    %21 = arith.addf %18, %20 : vector<16x128xf32>
    %cst_7 = arith.constant 9.99999997E-7 : f32
    %22 = vector.broadcast %cst_7 : f32 to vector<16x128xf32>
    %23 = arith.addf %19, %22 : vector<16x128xf32>
    %24 = arith.subf %21, %23 : vector<16x128xf32>
    %cst_8 = arith.constant 0.000000e+00 : f32
    %25 = vector.broadcast %cst_8 : f32 to vector<16x128xf32>
    %26 = arith.select %17, %24, %25 : vector<16x128xi1>, vector<16x128xf32>
    %27 = arith.mulf %26, %26 : vector<16x128xf32>
    %c0_9 = arith.constant 0 : index
    %c0_10 = arith.constant 0 : index
    %28 = vector.load %arg5[%c0_9, %c0_10] : memref<8x128xf32, #tpu.memory_space<vmem>>, vector<8x128xf32>
    %29 = vector.shape_cast %27 : vector<16x128xf32> to vector<2x8x128xf32>
    %cst_11 = arith.constant dense<0.000000e+00> : vector<8x128xf32>
    %30 = vector.multi_reduction <add>, %29, %cst_11 [0] : vector<2x8x128xf32> to vector<8x128xf32>
    %31 = arith.addf %28, %30 : vector<8x128xf32>
    %c0_12 = arith.constant 0 : index
    %c0_13 = arith.constant 0 : index
    %32 = vector.load %arg5[%c0_12, %c0_13] : memref<8x128xf32, #tpu.memory_space<vmem>>, vector<8x128xf32>
    tpu.vector_store %arg5[%c0_12, %c0_13], %31 {strides = array<i32>} : memref<8x128xf32, #tpu.memory_space<vmem>>, vector<8x128xf32>,
    %c0_i32_14 = arith.constant 0 : i32
    %33 = arith.cmpi eq, %arg1, %c0_i32_14 : i32
    %34 = arith.extui %33 : i1 to i32
    %c0_i32_15 = arith.constant 0 : i32
    %35 = arith.cmpi ne, %34, %c0_i32_15 : i32
    scf.if %35 {
      %c0_16 = arith.constant 0 : index
      %c0_17 = arith.constant 0 : index
      %36 = vector.load %arg5[%c0_16, %c0_17] : memref<8x128xf32, #tpu.memory_space<vmem>>, vector<8x128xf32>
      %37 = vector.shape_cast %36 : vector<8x128xf32> to vector<1x8x128xf32>
      %c0_18 = arith.constant 0 : index
      %c0_19 = arith.constant 0 : index
      %c0_20 = arith.constant 0 : index
      %38 = vector.load %arg4[%c0_18, %c0_19, %c0_20] : memref<1x8x128xf32, #tpu.memory_space<vmem>>, vector<1x8x128xf32>
      tpu.vector_store %arg4[%c0_18, %c0_19, %c0_20], %37 {strides = array<i32>} : memref<1x8x128xf32, #tpu.memory_space<vmem>>, vector<1x8x128xf32>,
    } else {
    }
    return
  }
  func.func @transform_0(%arg0: i32, %arg1: i32) -> (i32, i32) {
    %c1_i32 = arith.constant 1 : i32
    %0 = arith.muli %arg0, %c1_i32 : i32
    %1 = arith.addi %0, %arg1 : i32
    %c0_i32 = arith.constant 0 : i32
    %2 = arith.minsi %1, %c0_i32 : i32
    %c0_i32_0 = arith.constant 0 : i32
    %c0_i32_1 = arith.constant 0 : i32
    return %2, %c0_i32_0 : i32, i32
  }
  func.func @transform_1(%arg0: i32, %arg1: i32) -> (i32, i32) {
    %c1_i32 = arith.constant 1 : i32
    %0 = arith.muli %arg0, %c1_i32 : i32
    %1 = arith.addi %0, %arg1 : i32
    %c0_i32 = arith.constant 0 : i32
    %2 = arith.minsi %1, %c0_i32 : i32
    %c0_i32_0 = arith.constant 0 : i32
    %c0_i32_1 = arith.constant 0 : i32
    return %2, %c0_i32_0 : i32, i32
  }
  func.func @transform_2(%arg0: i32, %arg1: i32) -> (i32, i32, i32) {
    %c0_i32 = arith.constant 0 : i32
    %c0_i32_0 = arith.constant 0 : i32
    %c0_i32_1 = arith.constant 0 : i32
    return %arg0, %c0_i32, %c0_i32_0 : i32, i32, i32
  }
}

</mosaic_0001>

<bundles_post_ra>
// kernel: tpu_custom_call.1
= control target key start
LH: loop header
LB: loop body
LE: loop exit
PB: predicated region body
PF: predicated region fallthrough
CT: control target
= control target key end

     0   :  { %7 = vsyncpa [#allocation4], 0  ;;  %s260_s0 = inlined_call_operand.hbm [shape: f32[16,128], index: 0, kind: input, shape index: {}]   ;;  %s261_s1 = inlined_call_operand.hbm [shape: f32[16,128], index: 1, kind: input, shape index: {}]   ;;  %s262_s2 = inlined_call_operand.hbm [shape: f32[1,8,128], index: 2, kind: output, shape index: {}]  }
   0x1   :  { %8 = vsyncpa [#allocation7], 0 }
   0x2   :  { %9 = vsyncpa [#allocation5], 0  ;;  %s204_s9 = smov [#allocation3]   ;;  %s132_s13 = scalar_lea.hbm %s260_s0, 256 }
   0x3   :  { %s21_s10 = sshll.u32 %s204_s9, 4  ;;  %p133_p0 = scmp.ne.s32.totalorder %s260_s0, %s132_s13  ;;  %s22_s10 = int_to_ptr.vmem [resolvable:$true] %s21_s10 }
   0x4   :  { %p136_p1 = scmp.lt.u32.totalorder %s132_s13, %s260_s0 }
   0x6   :  { %p138_p2 = pnand %p136_p1, %p133_p0 }
   0x8   :  { %141 = shalt.err (!%p138_p2)
}
   0x9   :  { %s142_s18 = scalar_lea.vmem %s22_s10, 256  ;;  %p147_p4 = scmp.lt.s32.totalorder %s22_s10, %s22_s10 }
   0xa   :  { %p143_p3 = scmp.ne.s32.totalorder %s22_s10, %s142_s18  ;;  %p148_p5 = scmp.lt.s32.totalorder %s142_s18, %s142_s18 }
   0xc   :  { %p149_p6 = por %p148_p5, %p147_p4 }
   0xe   :  { %p150_p7 = pnand %p149_p6, %p143_p3 }
  0x10   :  { %153 = shalt.err (!%p150_p7)
}
  0x11   :  { %s205_s19 = smov 128   ;;  %s206_s20 = smov 8  }
  0x12   :  { %27 = dma.hbm_to_vmem [thread:$0]  %s260_s0, 256, %s22_s10, [#allocation4], %s205_s19, %s205_s19, %s206_s20  }
  0x13   :  { %s207_s23 = smov [#allocation6]   ;;  %s154_s27 = scalar_lea.hbm %s261_s1, 256 }
  0x14   :  { %s39_s24 = sshll.u32 %s207_s23, 4  ;;  %p155_p8 = scmp.ne.s32.totalorder %s261_s1, %s154_s27  ;;  %s40_s24 = int_to_ptr.vmem [resolvable:$true] %s39_s24 }
  0x15   :  { %p158_p9 = scmp.lt.u32.totalorder %s154_s27, %s261_s1 }
  0x17   :  { %p160_p10 = pnand %p158_p9, %p155_p8 }
  0x19   :  { %163 = shalt.err (!%p160_p10)
}
  0x1a   :  { %s164_s4 = scalar_lea.vmem %s40_s24, 256  ;;  %p169_p12 = scmp.lt.s32.totalorder %s40_s24, %s40_s24 }
  0x1b   :  { %p165_p11 = scmp.ne.s32.totalorder %s40_s24, %s164_s4  ;;  %p170_p13 = scmp.lt.s32.totalorder %s164_s4, %s164_s4 }
  0x1d   :  { %p171_p0 = por %p170_p13, %p169_p12 }
  0x1f   :  { %p172_p1 = pnand %p171_p0, %p165_p11 }
  0x21   :  { %175 = shalt.err (!%p172_p1)
}
  0x22   :  { %45 = dma.hbm_to_vmem [thread:$0]  %s261_s1, 256, %s40_s24, [#allocation7], %s205_s19, %s205_s19, %s206_s20  }
  0x23   :  { %198 = dma.done.wait [#allocation4], 256  }
  0x24   :  { %199 = vsyncadd [#allocation4], 4294967040 }
  0x25   :  { %200 = dma.done.wait [#allocation7], 256  }
  0x26   :  { %201 = vsyncadd [#allocation7], 4294967040  ;;  %v84_v0 = vld [vmem:[#allocation3] sm:$0xff]  ;;  %v85_v1 = vld [vmem:[#allocation3 + $0x8] sm:$0xff]  ;;  %s208_s6 = smov [#allocation8]  }
  0x27   :  { %v86_v2 = vld [vmem:[#allocation6] sm:$0xff]  ;;  %v87_v3 = vld [vmem:[#allocation6 + $0x8] sm:$0xff]  ;;  %v88_v4 = vadd.f32 1e-06, %v84_v0  ;;  %v89_v5 = vadd.f32 1e-06, %v85_v1 }
  0x28   :  { %v90_v6 = vadd.f32 1e-06, %v86_v2  ;;  %v91_v7 = vadd.f32 1e-06, %v87_v3  ;;  %s113_s7 = sshll.u32 %s208_s6, 4  ;;  %s114_s7 = int_to_ptr.vmem [resolvable:$true] %s113_s7 }
  0x29   :  { %s176_s1 = scalar_lea.vmem %s114_s7, 128  ;;  %p181_p3 = scmp.lt.s32.totalorder %s114_s7, %s114_s7 }
  0x2a   :  { %v92_v8 = vsub.f32 %v88_v4, %v90_v6  ;;  %v93_v9 = vsub.f32 %v89_v5, %v91_v7  ;;  %p177_p2 = scmp.ne.s32.totalorder %s114_s7, %s176_s1  ;;  %p182_p4 = scmp.lt.s32.totalorder %s176_s1, %s176_s1 }
  0x2c   :  { %v96_v10 = vmul.f32 %v92_v8, %v92_v8  ;;  %v97_v11 = vmul.f32 %v93_v9, %v93_v9  ;;  %p183_p5 = por %p182_p4, %p181_p3 }
  0x2e   :  { %v99_v12 = vadd.f32 %v97_v11, %v96_v10  ;;  %p184_p6 = pnand %p183_p5, %p177_p2 }
  0x30   :  { %106 = vst [vmem:[#allocation8] sm:$0xff] %v99_v12 }
  0x31   :  { %187 = shalt.err (!%p184_p6)
}
  0x32   :  { %s188_s10 = scalar_lea.hbm %s262_s2, 128 }
  0x33   :  { %p189_p7 = scmp.ne.s32.totalorder %s262_s2, %s188_s10  ;;  %p192_p8 = scmp.lt.u32.totalorder %s188_s10, %s262_s2 }
  0x35   :  { %p194_p9 = pnand %p192_p8, %p189_p7 }
  0x37   :  { %197 = shalt.err (!%p194_p9)
}
  0x38   :  { %116 = dma.vmem_to_hbm [thread:$0]  %s114_s7, 128, %s262_s2, [#allocation5]  }
  0x39   :  { %202 = dma.done.wait [#allocation5], 128  }
  0x3a   :  { %203 = vsyncadd [#allocation5], 4294967168 }
  0x3b   :  { %120 = vsyncpa [#allocation4], 1 }
  0x3c   :  { %121 = vsyncpa [#allocation7], 1 }
  0x3d   :  { %122 = vsyncpa [#allocation5], 1 }

</bundles_post_ra>
